<compile_context>
chip_gen: v6e
topology: v6e:2x2x1
jax: 0.10.0
libtpu: 0.0.40
codegen_flags: <defaults>
</compile_context>

<pallas_src>
import functools

import jax
import jax.numpy as jnp
from jax.experimental import pallas as pl
from jax.experimental.pallas import tpu as pltpu


def fls_kernel(x_ref, mu_ref, w_ref, h_aug_ref, out_ref, *, num_valid_rules):
    x = x_ref[...]            # (TB, D)
    mu = mu_ref[...]          # (D, Rp)   rule centers (padded cols are 0)
    w = w_ref[...]            # (D, Rp)   1/(2*sigma^2) (padded cols are 0)
    h_aug = h_aug_ref[...]    # (Rp, Y+1) [heights | ones], padded rows are 0

    tb = x.shape[0]
    d_dim = x.shape[1]
    rp = mu.shape[1]
    y_dim = out_ref.shape[1]

    # --- GaussianInferenceLayer: z[b,r] = sum_d (x[b,d]-mu[d,r])^2 * w[d,r] ---
    # Lane-dense (TB, Rp) accumulator; D is a short static unroll (pure VALU).
    z = jnp.zeros((tb, rp), dtype=jnp.float32)
    for d in range(d_dim):
        diff = x[:, d:d + 1] - mu[d, :][None, :]               # (TB, Rp)
        z = z + diff * diff * w[d, :][None, :]

    # Mask padded rules and stabilize the exp (softmax-style shift by the
    # per-row min of z; the num/den ratio is unchanged, den >= 1 afterwards).
    valid = jax.lax.broadcasted_iota(jnp.int32, (tb, rp), 1) < num_valid_rules
    z = jnp.where(valid, z, jnp.inf)
    m = jnp.min(z, axis=-1, keepdims=True)                      # (TB, 1)
    firing = jnp.where(valid, jnp.exp(m - z), 0.0)              # (TB, Rp)

    # --- HeightDefuzzifierLayer: fused num/den via augmented-heights matmul ---
    nd = jnp.dot(firing, h_aug, preferred_element_type=jnp.float32)  # (TB, Y+1)
    out_ref[...] = nd[:, :y_dim] * pl.reciprocal(nd[:, y_dim:y_dim + 1],
                                                 approx=True)


def fls_forward(x, mu, sigma, heights):
    """x: (B, xDim); mu/sigma: (xDim, rule_num); heights: (rule_num, yDim)."""
    x = x.astype(jnp.float32)
    B, D = x.shape
    R = mu.shape[1]
    Y = heights.shape[1]

    # Pad rules to a lane-dense multiple of 128; padded rules masked in-kernel.
    Rp = ((R + 127) // 128) * 128

    # Precompute 1/(2*sigma^2) so the kernel hot loop has no divides.
    w = 1.0 / (2.0 * sigma.astype(jnp.float32) * sigma.astype(jnp.float32))
    mu_p = jnp.zeros((D, Rp), jnp.float32).at[:, :R].set(mu.astype(jnp.float32))
    w_p = jnp.zeros((D, Rp), jnp.float32).at[:, :R].set(w)
    # Heights augmented with a ones column -> one matmul gives [num | den].
    h_aug = jnp.zeros((Rp, Y + 1), jnp.float32)
    h_aug = h_aug.at[:R, :Y].set(heights.astype(jnp.float32))
    h_aug = h_aug.at[:R, Y].set(1.0)

    # Batch tile: largest tile that comfortably fits a 32 MiB scoped VMEM
    # budget on every generation (raised explicitly below; v5e default is 16M).
    TB = B if B <= 1024 else 1024
    grid = (pl.cdiv(B, TB),)

    cost = pl.CostEstimate(
        flops=int(3 * B * Rp * D + 2 * B * Rp * (Y + 1) + 4 * B * Rp),
        transcendentals=int(B * Rp),
        bytes_accessed=int(4 * (B * D + B * Y + 2 * D * Rp + Rp * (Y + 1))),
    )

    kernel = functools.partial(fls_kernel, num_valid_rules=R)

    return pl.pallas_call(
        kernel,
        out_shape=jax.ShapeDtypeStruct((B, Y), jnp.float32),
        grid_spec=pltpu.PrefetchScalarGridSpec(
            num_scalar_prefetch=0,
            grid=grid,
            in_specs=[
                pl.BlockSpec((TB, D), lambda i: (i, 0)),      # x tiled over batch
                pl.BlockSpec((D, Rp), lambda i: (0, 0)),      # params stay resident
                pl.BlockSpec((D, Rp), lambda i: (0, 0)),
                pl.BlockSpec((Rp, Y + 1), lambda i: (0, 0)),
            ],
            out_specs=pl.BlockSpec((TB, Y), lambda i: (i, 0)),
        ),
        compiler_params=pltpu.CompilerParams(
            dimension_semantics=("parallel",),
            vmem_limit_bytes=32 * 1024 * 1024,
        ),
        cost_estimate=cost,
    )(x, mu_p, w_p, h_aug)


if __name__ == "__main__":
    B, xDim, rule_num, yDim = 8, 4, 16, 1

    key = jax.random.PRNGKey(0)
    kx, kmu, ksig, kh = jax.random.split(key, 4)

    x = jax.random.normal(kx, (B, xDim), dtype=jnp.float32)
    # Deterministic synthetic parameters (shapes implied by the module __init__).
    mu = jax.random.uniform(kmu, (xDim, rule_num), dtype=jnp.float32,
                            minval=-1.0, maxval=1.0)
    sigma = jax.random.uniform(ksig, (xDim, rule_num), dtype=jnp.float32,
                               minval=0.5, maxval=1.5)   # keep strictly positive
    heights = jax.random.normal(kh, (rule_num, yDim), dtype=jnp.float32)

    out = fls_forward(x, mu, sigma, heights)
    out = jax.block_until_ready(out)

    # Pure-JAX reference (original, unstabilized formulation) for sanity check.
    diff = x[:, :, None] - mu[None, :, :]                        # (B, D, R)
    zr = (diff * diff) / (2.0 * sigma * sigma)[None, :, :]
    firing = jnp.exp(-jnp.sum(zr, axis=1))                       # (B, R)
    ref = (firing @ heights) / jnp.sum(firing, axis=-1, keepdims=True)

    assert out.shape == (B, yDim)
    assert bool(jnp.all(jnp.isfinite(out)))
    assert bool(jnp.allclose(out, ref, rtol=1e-2, atol=1e-2))
    print("KERNEL_OK")
</pallas_src>

<mosaic_0001>
module attributes {stable_mosaic.version = 11 : i64} {
  func.func @fls_kernel(%arg0: i32, %arg1: memref<8x4xf32, #tpu.memory_space<vmem>>, %arg2: memref<4x128xf32, #tpu.memory_space<vmem>>, %arg3: memref<4x128xf32, #tpu.memory_space<vmem>>, %arg4: memref<128x2xf32, #tpu.memory_space<vmem>>, %arg5: memref<8x1xf32, #tpu.memory_space<vmem>>) attributes {dimension_semantics = [#tpu.dimension_semantics<parallel>], iteration_bounds = array<i64: 1>, scalar_prefetch = 0 : i64, scratch_operands = 0 : i64, tpu.core_type = #tpu.core_type<tc>, window_params = [{transform_indices = @transform_0, window_bounds = array<i64: 8, 4>}, {pipeline_mode = #tpu.pipeline_mode<synchronous>, transform_indices = @transform_1, window_bounds = array<i64: 4, 128>}, {pipeline_mode = #tpu.pipeline_mode<synchronous>, transform_indices = @transform_2, window_bounds = array<i64: 4, 128>}, {pipeline_mode = #tpu.pipeline_mode<synchronous>, transform_indices = @transform_3, window_bounds = array<i64: 128, 2>}, {transform_indices = @transform_4, window_bounds = array<i64: 8, 1>}]} {
    %c0 = arith.constant 0 : index
    %c0_0 = arith.constant 0 : index
    %0 = vector.load %arg1[%c0, %c0_0] : memref<8x4xf32, #tpu.memory_space<vmem>>, vector<8x4xf32>
    %c0_1 = arith.constant 0 : index
    %c0_2 = arith.constant 0 : index
    %1 = vector.load %arg2[%c0_1, %c0_2] : memref<4x128xf32, #tpu.memory_space<vmem>>, vector<4x128xf32>
    %c0_3 = arith.constant 0 : index
    %c0_4 = arith.constant 0 : index
    %2 = vector.load %arg3[%c0_3, %c0_4] : memref<4x128xf32, #tpu.memory_space<vmem>>, vector<4x128xf32>
    %c0_5 = arith.constant 0 : index
    %c0_6 = arith.constant 0 : index
    %3 = vector.load %arg4[%c0_5, %c0_6] : memref<128x2xf32, #tpu.memory_space<vmem>>, vector<128x2xf32>
    %cst = arith.constant 0.000000e+00 : f32
    %4 = vector.broadcast %cst : f32 to vector<8x128xf32>
    %5 = vector.extract_strided_slice %0 {offsets = [0, 0], sizes = [8, 1], strides = [1, 1]} : vector<8x4xf32> to vector<8x1xf32>
    %6 = vector.extract_strided_slice %1 {offsets = [0, 0], sizes = [1, 128], strides = [1, 1]} : vector<4x128xf32> to vector<1x128xf32>
    %7 = vector.shape_cast %6 : vector<1x128xf32> to vector<128xf32>
    %8 = vector.shape_cast %7 : vector<128xf32> to vector<1x128xf32>
    %9 = vector.broadcast %5 : vector<8x1xf32> to vector<8x128xf32>
    %10 = vector.broadcast %8 : vector<1x128xf32> to vector<8x128xf32>
    %11 = arith.subf %9, %10 : vector<8x128xf32>
    %12 = arith.mulf %11, %11 : vector<8x128xf32>
    %13 = vector.extract_strided_slice %2 {offsets = [0, 0], sizes = [1, 128], strides = [1, 1]} : vector<4x128xf32> to vector<1x128xf32>
    %14 = vector.shape_cast %13 : vector<1x128xf32> to vector<128xf32>
    %15 = vector.shape_cast %14 : vector<128xf32> to vector<1x128xf32>
    %16 = vector.broadcast %15 : vector<1x128xf32> to vector<8x128xf32>
    %17 = arith.mulf %12, %16 : vector<8x128xf32>
    %18 = arith.addf %4, %17 : vector<8x128xf32>
    %19 = vector.extract_strided_slice %0 {offsets = [0, 1], sizes = [8, 1], strides = [1, 1]} : vector<8x4xf32> to vector<8x1xf32>
    %20 = vector.extract_strided_slice %1 {offsets = [1, 0], sizes = [1, 128], strides = [1, 1]} : vector<4x128xf32> to vector<1x128xf32>
    %21 = vector.shape_cast %20 : vector<1x128xf32> to vector<128xf32>
    %22 = vector.shape_cast %21 : vector<128xf32> to vector<1x128xf32>
    %23 = vector.broadcast %19 : vector<8x1xf32> to vector<8x128xf32>
    %24 = vector.broadcast %22 : vector<1x128xf32> to vector<8x128xf32>
    %25 = arith.subf %23, %24 : vector<8x128xf32>
    %26 = arith.mulf %25, %25 : vector<8x128xf32>
    %27 = vector.extract_strided_slice %2 {offsets = [1, 0], sizes = [1, 128], strides = [1, 1]} : vector<4x128xf32> to vector<1x128xf32>
    %28 = vector.shape_cast %27 : vector<1x128xf32> to vector<128xf32>
    %29 = vector.shape_cast %28 : vector<128xf32> to vector<1x128xf32>
    %30 = vector.broadcast %29 : vector<1x128xf32> to vector<8x128xf32>
    %31 = arith.mulf %26, %30 : vector<8x128xf32>
    %32 = arith.addf %18, %31 : vector<8x128xf32>
    %33 = vector.extract_strided_slice %0 {offsets = [0, 2], sizes = [8, 1], strides = [1, 1]} : vector<8x4xf32> to vector<8x1xf32>
    %34 = vector.extract_strided_slice %1 {offsets = [2, 0], sizes = [1, 128], strides = [1, 1]} : vector<4x128xf32> to vector<1x128xf32>
    %35 = vector.shape_cast %34 : vector<1x128xf32> to vector<128xf32>
    %36 = vector.shape_cast %35 : vector<128xf32> to vector<1x128xf32>
    %37 = vector.broadcast %33 : vector<8x1xf32> to vector<8x128xf32>
    %38 = vector.broadcast %36 : vector<1x128xf32> to vector<8x128xf32>
    %39 = arith.subf %37, %38 : vector<8x128xf32>
    %40 = arith.mulf %39, %39 : vector<8x128xf32>
    %41 = vector.extract_strided_slice %2 {offsets = [2, 0], sizes = [1, 128], strides = [1, 1]} : vector<4x128xf32> to vector<1x128xf32>
    %42 = vector.shape_cast %41 : vector<1x128xf32> to vector<128xf32>
    %43 = vector.shape_cast %42 : vector<128xf32> to vector<1x128xf32>
    %44 = vector.broadcast %43 : vector<1x128xf32> to vector<8x128xf32>
    %45 = arith.mulf %40, %44 : vector<8x128xf32>
    %46 = arith.addf %32, %45 : vector<8x128xf32>
    %47 = vector.extract_strided_slice %0 {offsets = [0, 3], sizes = [8, 1], strides = [1, 1]} : vector<8x4xf32> to vector<8x1xf32>
    %48 = vector.extract_strided_slice %1 {offsets = [3, 0], sizes = [1, 128], strides = [1, 1]} : vector<4x128xf32> to vector<1x128xf32>
    %49 = vector.shape_cast %48 : vector<1x128xf32> to vector<128xf32>
    %50 = vector.shape_cast %49 : vector<128xf32> to vector<1x128xf32>
    %51 = vector.broadcast %47 : vector<8x1xf32> to vector<8x128xf32>
    %52 = vector.broadcast %50 : vector<1x128xf32> to vector<8x128xf32>
    %53 = arith.subf %51, %52 : vector<8x128xf32>
    %54 = arith.mulf %53, %53 : vector<8x128xf32>
    %55 = vector.extract_strided_slice %2 {offsets = [3, 0], sizes = [1, 128], strides = [1, 1]} : vector<4x128xf32> to vector<1x128xf32>
    %56 = vector.shape_cast %55 : vector<1x128xf32> to vector<128xf32>
    %57 = vector.shape_cast %56 : vector<128xf32> to vector<1x128xf32>
    %58 = vector.broadcast %57 : vector<1x128xf32> to vector<8x128xf32>
    %59 = arith.mulf %54, %58 : vector<8x128xf32>
    %60 = arith.addf %46, %59 : vector<8x128xf32>
    %61 = tpu.iota {dimensions = array<i32: 1>} : vector<8x128xi32>
    %c16_i32 = arith.constant 16 : i32
    %62 = vector.broadcast %c16_i32 : i32 to vector<8x128xi32>
    %63 = arith.cmpi slt, %61, %62 : vector<8x128xi32>
    %cst_7 = arith.constant 0x7F800000 : f32
    %64 = vector.broadcast %cst_7 : f32 to vector<8x128xf32>
    %65 = arith.select %63, %60, %64 : vector<8x128xi1>, vector<8x128xf32>
    %cst_8 = arith.constant dense<0x7F800000> : vector<8xf32>
    %66 = vector.multi_reduction <minimumf>, %65, %cst_8 [1] : vector<8x128xf32> to vector<8xf32>
    %67 = vector.shape_cast %66 : vector<8xf32> to vector<8x1xf32>
    %68 = vector.broadcast %67 : vector<8x1xf32> to vector<8x128xf32>
    %69 = arith.subf %68, %65 : vector<8x128xf32>
    %70 = math.exp %69 : vector<8x128xf32>
    %cst_9 = arith.constant 0.000000e+00 : f32
    %71 = vector.broadcast %cst_9 : f32 to vector<8x128xf32>
    %72 = arith.select %63, %70, %71 : vector<8x128xi1>, vector<8x128xf32>
    %cst_10 = arith.constant dense<0.000000e+00> : vector<8x2xf32>
    %73 = tpu.matmul %72, %3, %cst_10 {dimension_numbers = #tpu.dot_dimension_numbers<[1], [0], [0], [1], [0, 0, 1, 1], [], []>} : vector<8x128xf32>, vector<128x2xf32>, vector<8x2xf32> -> vector<8x2xf32>
    %74 = vector.extract_strided_slice %73 {offsets = [0, 0], sizes = [8, 1], strides = [1, 1]} : vector<8x2xf32> to vector<8x1xf32>
    %75 = vector.extract_strided_slice %73 {offsets = [0, 1], sizes = [8, 1], strides = [1, 1]} : vector<8x2xf32> to vector<8x1xf32>
    %76 = tpu.reciprocal %75 {approx = true} : vector<8x1xf32> -> vector<8x1xf32>
    %77 = arith.mulf %74, %76 : vector<8x1xf32>
    %c0_11 = arith.constant 0 : index
    %c0_12 = arith.constant 0 : index
    %78 = vector.load %arg5[%c0_11, %c0_12] : memref<8x1xf32, #tpu.memory_space<vmem>>, vector<8x1xf32>
    tpu.vector_store %arg5[%c0_11, %c0_12], %77 {strides = array<i32>} : memref<8x1xf32, #tpu.memory_space<vmem>>, vector<8x1xf32>,
    return
  }
  func.func @transform_0(%arg0: i32) -> (i32, i32) {
    %c0_i32 = arith.constant 0 : i32
    %c0_i32_0 = arith.constant 0 : i32
    return %arg0, %c0_i32 : i32, i32
  }
  func.func @transform_1(%arg0: i32) -> (i32, i32) {
    %c0_i32 = arith.constant 0 : i32
    %c0_i32_0 = arith.constant 0 : i32
    %c0_i32_1 = arith.constant 0 : i32
    return %c0_i32, %c0_i32_0 : i32, i32
  }
  func.func @transform_2(%arg0: i32) -> (i32, i32) {
    %c0_i32 = arith.constant 0 : i32
    %c0_i32_0 = arith.constant 0 : i32
    %c0_i32_1 = arith.constant 0 : i32
    return %c0_i32, %c0_i32_0 : i32, i32
  }
  func.func @transform_3(%arg0: i32) -> (i32, i32) {
    %c0_i32 = arith.constant 0 : i32
    %c0_i32_0 = arith.constant 0 : i32
    %c0_i32_1 = arith.constant 0 : i32
    return %c0_i32, %c0_i32_0 : i32, i32
  }
  func.func @transform_4(%arg0: i32) -> (i32, i32) {
    %c0_i32 = arith.constant 0 : i32
    %c0_i32_0 = arith.constant 0 : i32
    return %arg0, %c0_i32 : i32, i32
  }
}

</mosaic_0001>

<bundles_post_ra>
// kernel: tpu_custom_call.1
= control target key start
LH: loop header
LB: loop body
LE: loop exit
PB: predicated region body
PF: predicated region fallthrough
CT: control target
= control target key end

     0   :  { %v262_v0 = vmov 0   ;;  %v263_v2 = vmov 2   ;;  %v264_v3 = vmov 1   ;;  %v265_v4 = vmov 3   ;;  %s268_s23 = smov 127   ;;  %s373_s0 = inlined_call_operand.vmem [shape: f32[8,4], index: 0, kind: input, shape index: {}]   ;;  %s374_s3 = inlined_call_operand.vmem [shape: f32[128,2], index: 3, kind: input, shape index: {}]   ;;  %s375_s1 = inlined_call_operand.vmem [shape: f32[4,128], index: 1, kind: input, shape index: {}]   ;;  %s376_s2 = inlined_call_operand.vmem [shape: f32[4,128], index: 2, kind: input, shape index: {}]   ;;  %s377_s4 = inlined_call_operand.vmem [shape: f32[8,1], index: 4, kind: output, shape index: {}]  }
   0x1   :  { %253 = vset.pattern.permute.xlu0 %v262_v0  ;;  %v17_v1 = vld [vmem:[%s373_s0] sm:$0xff]  ;;  %255 = vset.pattern.permute.xlu1 %v263_v2  ;;  %v266_v5 = vmov 0.0   ;;  %v35_v6 = vld [vmem:[%s374_s3 + $0x78] sm:$0xff]  ;;  %v34_v7 = vld [vmem:[%s374_s3 + $0x70] sm:$0xff]  ;;  %v41_v13 = vlaneseq  ;;  %vm267_vm1 = vmmov 0   ;;  %vm187_vm2 = vcmask 7168  }
   0x2   :  { %38 = vperm.xlu0 %253, %v17_v1   ;;  %70 = vperm.xlu1 %255, %v17_v1   ;;  %v33_v8 = vld [vmem:[%s374_s3 + $0x68] sm:$0xff]  ;;  %v32_v9 = vld [vmem:[%s374_s3 + $0x60] sm:$0xff]  ;;  %v31_v10 = vld [vmem:[%s374_s3 + $0x58] sm:$0xff] }
   0x3   :  { %211 = vmatprep.subr.mxu0 %v266_v5  ;;  %v30_v11 = vld [vmem:[%s374_s3 + $0x50] sm:$0xff]  ;;  %v29_v12 = vld [vmem:[%s374_s3 + $0x48] sm:$0xff]  ;;  %v42_v14 = vshrl.u32 %v41_v13, 7  ;;  %v18_v16 = vld [vmem:[%s375_s1] sm:$0xf]  ;;  %v102_v43 = vand.u32 127, %v41_v13  ;;  %243 = vmatprep.mubr.msk.f32.mxu0 %vm267_vm1, %v266_v5 }
   0x4   :  { %212 = vmatpush3.msra.mxu0 %v35_v6  ;;  %v19_v24 = vld [vmem:[%s376_s2] sm:$0xf]  ;;  %v27_v51 = vld [vmem:[%s374_s3 + $0x38] sm:$0xff]  ;;  %v26_v52 = vld [vmem:[%s374_s3 + $0x30] sm:$0xff] }
   0x5   :  { %213 = vmatprep.subr.mxu0 %v266_v5  ;;  %v43_v15 = vsub.s32 0, %v42_v14  ;;  %v75_v17 = vsub.s32 2, %v42_v14  ;;  %v59_v19 = vsub.s32 1, %v42_v14  ;;  %v91_v20 = vsub.s32 3, %v42_v14  ;;  %v28_v50 = vld [vmem:[%s374_s3 + $0x40] sm:$0xff]  ;;  %v25_v53 = vld [vmem:[%s374_s3 + $0x28] sm:$0xff] }
   0x6   :  { %254 = vset.pattern.permute.xlu0 %v264_v3  ;;  %256 = vset.pattern.permute.xlu1 %v265_v4  ;;  %vm103_vm0 = vcmp.lt.s32.totalorder %v102_v43, 16  ;;  %v24_v54 = vld [vmem:[%s374_s3 + $0x20] sm:$0xff]  ;;  %v23_v55 = vld [vmem:[%s374_s3 + $0x18] sm:$0xff]  ;;  %v22_v56 = vld [vmem:[%s374_s3 + $0x10] sm:$0xff] }
   0x7   :  { %54 = vperm.xlu0 %254, %v17_v1   ;;  %86 = vperm.xlu1 %256, %v17_v1   ;;  %v44_v18 = vrot.slane %v18_v16, %v43_v15  ;;  %v76_v22 = vrot.slane %v18_v16, %v75_v17  ;;  %v60_v26 = vrot.slane %v18_v16, %v59_v19  ;;  %v21_v57 = vld [vmem:[%s374_s3 + $0x8] sm:$0xff]  ;;  %v20_v58 = vld [vmem:[%s374_s3] sm:$0xff] }
   0x8   :  { %214 = vmatpush3.msra.mxu0 %v34_v7  ;;  %v92_v27 = vrot.slane %v18_v16, %v91_v20  ;;  %v50_v29 = vrot.slane %v19_v24, %v43_v15  ;;  %v66_v33 = vrot.slane %v19_v24, %v59_v19  ;;  %v82_v36 = vrot.slane %v19_v24, %v75_v17 }
   0x9   :  { %215 = vmatprep.subr.mxu0 %v266_v5  ;;  %v98_v39 = vrot.slane %v19_v24, %v91_v20 }
   0xa   :  { %216 = vmatpush3.msra.mxu0 %v33_v8 }
   0xb   :  { %257 = vset.pattern.permute.xlu0 %v265_v4  ;;  %217 = vmatprep.subr.mxu0 %v266_v5 }
   0xc   :  { %218 = vmatpush3.msra.mxu0 %v32_v9 }
   0xd   :  { %219 = vmatprep.subr.mxu0 %v266_v5 }
   0xe   :  { %220 = vmatpush3.msra.mxu0 %v31_v10 }
   0xf   :  { %221 = vmatprep.subr.mxu0 %v266_v5 }
  0x10   :  { %222 = vmatpush3.msra.mxu0 %v30_v11 }
  0x11   :  { %223 = vmatprep.subr.mxu0 %v266_v5 }
  0x12   :  { %224 = vmatpush3.msra.mxu0 %v29_v12 }
  0x13   :  { %225 = vmatprep.subr.mxu0 %v266_v5 }
  0x14   :  { %226 = vmatpush3.msra.mxu0 %v28_v50 }
  0x15   :  { %227 = vmatprep.subr.mxu0 %v266_v5 }
  0x16   :  { %228 = vmatpush3.msra.mxu0 %v27_v51 }
  0x17   :  { %229 = vmatprep.subr.mxu0 %v266_v5 }
  0x18   :  { %230 = vmatpush3.msra.mxu0 %v26_v52 }
  0x19   :  { %231 = vmatprep.subr.mxu0 %v266_v5 }
  0x1a   :  { %232 = vmatpush3.msra.mxu0 %v25_v53 }
  0x1b   :  { %233 = vmatprep.subr.mxu0 %v266_v5 }
  0x1c   :  { %234 = vmatpush3.msra.mxu0 %v24_v54 }
  0x1d   :  { %235 = vmatprep.subr.mxu0 %v266_v5 }
  0x1e   :  { %236 = vmatpush3.msra.mxu0 %v23_v55 }
  0x1f   :  { %237 = vmatprep.subr.mxu0 %v266_v5 }
  0x20   :  { %238 = vmatpush3.msra.mxu0 %v22_v56 }
  0x21   :  { %239 = vmatprep.subr.mxu0 %v266_v5 }
  0x22   :  { %240 = vmatpush3.msra.mxu0 %v21_v57 }
  0x23   :  { %241 = vmatprep.subr.mxu0 %v266_v5 }
  0x24   :  { %242 = vmatpush3.msra.mxu0 %v20_v58 }
  0x7d   :  { %v39_v21 = vpop.permute.xlu0 %38  ;;  %v71_v23 = vpop.permute.xlu1 %70 }
  0x7e   :  { %v45_v25 = vsub.f32 %v39_v21, %v44_v18  ;;  %v77_v28 = vsub.f32 %v71_v23, %v76_v22 }
  0x80   :  { %v46_v32 = vmul.f32 %v45_v25, %v45_v25  ;;  %v78_v37 = vmul.f32 %v77_v28, %v77_v28 }
  0x82   :  { %v55_v30 = vpop.permute.xlu0 %54  ;;  %v87_v31 = vpop.permute.xlu1 %86  ;;  %v51_v41 = vmul.f32 %v50_v29, %v46_v32  ;;  %v83_v44 = vmul.f32 %v82_v36, %v78_v37 }
  0x83   :  { %v61_v34 = vsub.f32 %v55_v30, %v60_v26  ;;  %v93_v35 = vsub.f32 %v87_v31, %v92_v27 }
  0x85   :  { %v62_v38 = vmul.f32 %v61_v34, %v61_v34  ;;  %v94_v40 = vmul.f32 %v93_v35, %v93_v35 }
  0x87   :  { %v67_v42 = vmul.f32 %v66_v33, %v62_v38  ;;  %v99_v46 = vmul.f32 %v98_v39, %v94_v40 }
  0x89   :  { %v68_v45 = vadd.f32 %v67_v42, %v51_v41 }
  0x8b   :  { %v84_v47 = vadd.f32 %v83_v44, %v68_v45 }
  0x8d   :  { %v100_v48 = vadd.f32 %v99_v46, %v84_v47 }
  0x8f   :  { %v104_v49 = vsel %vm103_vm0, %v100_v48, inf }
  0x90   :  { %105 = vmin.xlane.f32.xlu1 %v104_v49 }
 0x119   :  { %v106_v59 = vpop.xlane.xlu1 %105 }
 0x11a   :  { %v107_v60 = vsub.f32 %v106_v59, %v104_v49 }
 0x11c   :  { %v108_v61 = vmul.f32 1.442695, %v107_v60 }
 0x11e   :  { %258 = vpow2.f32 %v108_v61 }
 0x12b   :  { %v259_v62 = vpop.eup %258 }
 0x12c   :  { %244 = vmatmul.mubr.msk.f32.vlgmr.msra.gmra.mxu0 %vm103_vm0, %v259_v62 }
 0x1ec   :  { %v177_v63 = vpop.f32.mrf.mxu0 }
 0x1ed   :  { %260 = vrcp.f32 %v177_v63 }
 0x1ee   :  { %v245_v0 = vpop.f32.mrf.mxu0 }
 0x1fa   :  { %v261_v1 = vpop.eup %260 }
 0x1fb   :  { %183 = vrot.lane.b32.xlu0 %v261_v1, %s268_s23 }
 0x26d   :  { %v184_v2 = vpop.permute.xlu0 %183 }
 0x26e   :  { %v186_v3 = vmul.f32 %v184_v2, %v177_v63 }
 0x270   :  { %188 = vst.msk [vmem:[%s377_s4] sm:$0xff] %vm187_vm2, %v186_v3 }

</bundles_post_ra>
